<compile_context>
chip_gen: v7x
topology: tpu7x:2x2x1
jax: 0.10.0
libtpu: 0.0.40
codegen_flags: <defaults>
</compile_context>

<pallas_src>
import functools

import jax
import jax.numpy as jnp
from jax.experimental import pallas as pl
from jax.experimental.pallas import tpu as pltpu

K = 3          # TAGConv number of hops (PyG default)
LANE = 128
SUBLANE = 8


# ----------------------------- fused Pallas kernel ---------------------------

def _tag_fused_kernel(a_ref, x_ref, wc_ref, bc_ref, p_ref, wf_ref, bf_ref,
                      o_ref, xcat_ref, *, num_layers, num_hops, hidden):
    """Whole TAG forward: stacked TAGConvs -> mean pool -> final linear.

    a_ref    : [N, N]            bf16  normalized adjacency (D^-1/2 A D^-1/2)
    x_ref    : [N, H]            bf16  node features, zero-padded to H channels
    wc_ref   : [L, (K+1)*H, H]   bf16  per-layer flattened TAGConv weights
    bc_ref   : [L, 1, H]         f32   per-layer TAGConv bias
    p_ref    : [Bp, N]           bf16  mean-pool matrix (rows padded to 8)
    wf_ref   : [H, Cpad]         bf16  final linear weight (lane-padded to 128)
    bf_ref   : [1, Cpad]         f32   final linear bias   (lane-padded to 128)
    o_ref    : [Bp, Cpad]        f32   dense (8,128) output tile
    xcat_ref : [N, (K+1)*H]      bf16  VMEM scratch holding [h, Ah, ..., A^K h]
    """
    a = a_ref[...]                                   # loaded once, reused by all layers
    h = x_ref[...]                                   # bf16 [N, H]
    for layer in range(num_layers):                  # unrolled at trace time
        xcat_ref[:, 0:hidden] = h
        xk = h
        for k in range(1, num_hops + 1):
            # bf16 x bf16 into the MXU, f32 accumulation, back to bf16 hop.
            xk = jnp.dot(a, xk,
                         preferred_element_type=jnp.float32).astype(jnp.bfloat16)
            xcat_ref[:, k * hidden:(k + 1) * hidden] = xk
        # Single 256-deep contraction against the flattened per-layer weight.
        h32 = jnp.dot(xcat_ref[...], wc_ref[layer],
                      preferred_element_type=jnp.float32) + bc_ref[layer]
        h = h32.astype(jnp.bfloat16)
    # global mean pool + final linear.
    # TODO(synk): F.dropout(p=0.5) is identity in eval mode; skipped here.
    pooled = jnp.dot(p_ref[...], h, preferred_element_type=jnp.float32)
    out = jnp.dot(pooled.astype(jnp.bfloat16), wf_ref[...],
                  preferred_element_type=jnp.float32)
    o_ref[...] = (out + bf_ref[...]).astype(o_ref.dtype)


# ------------------------------ wrapper / glue --------------------------------

def build_norm_adj(edge_index, num_nodes):
    """gcn_norm with add_self_loops=False (as used by TAGConv).

    Note: both D^{-1/2} factors come from in-degree (accumulated over `col`);
    identical to PyG gcn_norm for undirected graphs (this test's case).
    """
    row, col = edge_index[0], edge_index[1]          # src, dst
    a = jnp.zeros((num_nodes, num_nodes), jnp.float32).at[col, row].add(1.0)
    deg = jnp.zeros((num_nodes,), jnp.float32).at[col].add(1.0)
    dinv = jnp.where(deg > 0, jax.lax.rsqrt(jnp.maximum(deg, 1e-12)), 0.0)
    return a * dinv[:, None] * dinv[None, :]         # A_norm[dst, src]


def build_pool_matrix(batch, num_graphs, num_nodes):
    onehot = jnp.zeros((num_graphs, num_nodes), jnp.float32).at[
        batch, jnp.arange(num_nodes)].set(1.0)
    counts = jnp.maximum(onehot.sum(axis=1, keepdims=True), 1.0)
    return onehot / counts


def init_tag_params(key, num_node_features, hidden, num_hidden_layers, out_channels):
    params = {"convs": []}
    in_c = num_node_features
    for _ in range(1 + num_hidden_layers):
        key, kw, kb = jax.random.split(key, 3)
        w = jax.random.normal(kw, (K + 1, in_c, hidden), jnp.float32) * 0.1
        b = jax.random.normal(kb, (1, hidden), jnp.float32) * 0.1
        params["convs"].append((w, b))
        in_c = hidden
    key, kw, kb = jax.random.split(key, 3)
    params["final_w"] = jax.random.normal(kw, (hidden, out_channels), jnp.float32) * 0.1
    params["final_b"] = jax.random.normal(kb, (1, out_channels), jnp.float32) * 0.1
    return params


def _vmem_limit_bytes():
    """Generation-aware VMEM limit (v5e/v6e: 128 MiB physical, v7x: 64 MiB)."""
    try:
        cap = int(pltpu.get_tpu_info().vmem_capacity_bytes)
    except Exception:  # pragma: no cover - conservative fallback
        cap = 128 * 1024 * 1024
    return min(cap // 2, 64 * 1024 * 1024)


def _pad_flatten_conv_weight(w_stack, hidden):
    """[(K+1), in_c, H] -> [(K+1)*H, H], zero-padding in_c up to H."""
    if w_stack.shape[1] < hidden:
        w_stack = jnp.pad(w_stack,
                          ((0, 0), (0, hidden - w_stack.shape[1]), (0, 0)))
    return w_stack.reshape((K + 1) * hidden, hidden)


def tag_forward(params, x, edge_index, batch, num_graphs):
    n, cin = x.shape
    hidden = params["convs"][0][0].shape[-1]
    num_layers = len(params["convs"])
    out_c = params["final_w"].shape[1]

    # TODO(synk): for repeated inference on a fixed graph, hoist these O(N^2)
    # wrapper-side builds (adjacency / pool matrix) out of the per-call path.
    a_norm = build_norm_adj(edge_index, n).astype(jnp.bfloat16)
    pool_mat = build_pool_matrix(batch, num_graphs, n)

    # Zero-pad the input feature dim up to `hidden` so every layer's flattened
    # weight is [(K+1)*hidden, hidden] and all layers stack into one array.
    # Zero feature columns hit zero weight rows, so the math is unchanged.
    x_pad = jnp.pad(x, ((0, 0), (0, hidden - cin))).astype(jnp.bfloat16)

    wc = jnp.stack([_pad_flatten_conv_weight(w, hidden)
                    for w, _ in params["convs"]]).astype(jnp.bfloat16)   # [L,(K+1)H,H]
    bc = jnp.stack([b for _, b in params["convs"]])                      # [L,1,H] f32

    # Dense (8,128) output tile: pad graphs up to 8 sublanes, outputs to 128 lanes.
    b_pad = max(SUBLANE, ((num_graphs + SUBLANE - 1) // SUBLANE) * SUBLANE)
    c_pad = ((out_c + LANE - 1) // LANE) * LANE
    pool_pad = jnp.pad(pool_mat, ((0, b_pad - num_graphs), (0, 0))).astype(jnp.bfloat16)
    wf = jnp.pad(params["final_w"], ((0, 0), (0, c_pad - out_c))).astype(jnp.bfloat16)
    bf = jnp.pad(params["final_b"], ((0, 0), (0, c_pad - out_c)))        # f32

    kernel = functools.partial(_tag_fused_kernel,
                               num_layers=num_layers, num_hops=K, hidden=hidden)
    vmem = lambda: pl.BlockSpec(memory_space=pltpu.MemorySpace.VMEM)
    out = pl.pallas_call(
        kernel,
        out_shape=jax.ShapeDtypeStruct((b_pad, c_pad), jnp.float32),
        in_specs=[vmem() for _ in range(7)],
        out_specs=vmem(),
        scratch_shapes=[pltpu.VMEM((n, (K + 1) * hidden), jnp.bfloat16)],
        compiler_params=pltpu.CompilerParams(
            vmem_limit_bytes=_vmem_limit_bytes()),
    )(a_norm, x_pad, wc, bc, pool_pad, wf, bf)
    return out[:num_graphs, :out_c]


# ------------------------------ JAX references --------------------------------

def tag_forward_ref_f32(params, x, edge_index, batch, num_graphs):
    """Original module semantics, pure f32."""
    n = x.shape[0]
    a = build_norm_adj(edge_index, n)
    pool_mat = build_pool_matrix(batch, num_graphs, n)
    h = x
    for w_stack, b in params["convs"]:
        acc = h @ w_stack[0]
        xk = h
        for k in range(1, K + 1):
            xk = a @ xk
            acc = acc + xk @ w_stack[k]
        h = acc + b
    pooled = pool_mat @ h
    return pooled @ params["final_w"] + params["final_b"]


def tag_forward_ref_matched(params, x, edge_index, batch, num_graphs):
    """Mirrors the kernel's bf16-operand / f32-accumulate policy exactly."""
    n, cin = x.shape
    hidden = params["convs"][0][0].shape[-1]
    a = build_norm_adj(edge_index, n).astype(jnp.bfloat16)
    p = build_pool_matrix(batch, num_graphs, n).astype(jnp.bfloat16)
    h = jnp.pad(x, ((0, 0), (0, hidden - cin))).astype(jnp.bfloat16)
    for w_stack, b in params["convs"]:
        w_flat = _pad_flatten_conv_weight(w_stack, hidden).astype(jnp.bfloat16)
        hops, xk = [h], h
        for _ in range(K):
            xk = jnp.dot(a, xk,
                         preferred_element_type=jnp.float32).astype(jnp.bfloat16)
            hops.append(xk)
        xcat = jnp.concatenate(hops, axis=-1)
        h = (jnp.dot(xcat, w_flat, preferred_element_type=jnp.float32)
             + b).astype(jnp.bfloat16)
    pooled = jnp.dot(p, h, preferred_element_type=jnp.float32)
    out = jnp.dot(pooled.astype(jnp.bfloat16),
                  params["final_w"].astype(jnp.bfloat16),
                  preferred_element_type=jnp.float32)
    return out + params["final_b"]


# -------------------------------- main ----------------------------------------

if __name__ == "__main__":
    key = jax.random.PRNGKey(0)

    # Config matching TAGConfig defaults: 1 node feature, hidden 64, 3 hidden
    # layers, 5 outputs.
    num_node_features = 1
    hidden_channels = 64
    num_hidden_layers = 3
    out_channels = 5

    # Graph batch: 2 graphs x 8 nodes each (undirected rings).
    num_graphs = 2
    nodes_per_graph = 8
    n = num_graphs * nodes_per_graph

    src_list, dst_list = [], []
    for g in range(num_graphs):
        base = g * nodes_per_graph
        for i in range(nodes_per_graph):
            u = base + i
            v = base + (i + 1) % nodes_per_graph
            src_list += [u, v]
            dst_list += [v, u]
    edge_index = jnp.array([src_list, dst_list], dtype=jnp.int32)
    batch = jnp.repeat(jnp.arange(num_graphs, dtype=jnp.int32), nodes_per_graph)

    key, kx = jax.random.split(key)
    x = jax.random.normal(kx, (n, num_node_features), jnp.float32)

    params = init_tag_params(key, num_node_features, hidden_channels,
                             num_hidden_layers, out_channels)

    out = tag_forward(params, x, edge_index, batch, num_graphs)
    out = jax.block_until_ready(out)
    assert out.shape == (num_graphs, out_channels)

    # 1) Precision-matched reference (same bf16 operand policy as the kernel).
    ref_bf = tag_forward_ref_matched(params, x, edge_index, batch, num_graphs)
    assert jnp.allclose(out, ref_bf, atol=2e-3, rtol=2e-3), \
        "mismatch vs precision-matched JAX reference"

    # 2) Pure-f32 reference (original module semantics), bf16-level tolerance.
    ref_f32 = tag_forward_ref_f32(params, x, edge_index, batch, num_graphs)
    assert jnp.allclose(out, ref_f32, atol=8e-2, rtol=8e-2), \
        "mismatch vs f32 JAX reference"

    print("KERNEL_OK")
</pallas_src>

<mosaic_0001>
module attributes {stable_mosaic.version = 11 : i64} {
  func.func @_tag_fused_kernel(%arg0: memref<16x16xbf16, #tpu.memory_space<vmem>>, %arg1: memref<16x64xbf16, #tpu.memory_space<vmem>>, %arg2: memref<4x256x64xbf16, #tpu.memory_space<vmem>>, %arg3: memref<4x1x64xf32, #tpu.memory_space<vmem>>, %arg4: memref<8x16xbf16, #tpu.memory_space<vmem>>, %arg5: memref<64x128xbf16, #tpu.memory_space<vmem>>, %arg6: memref<1x128xf32, #tpu.memory_space<vmem>>, %arg7: memref<8x128xf32, #tpu.memory_space<vmem>>, %arg8: memref<16x256xbf16, #tpu.memory_space<vmem>>) attributes {dimension_semantics = [], scalar_prefetch = 0 : i64, scratch_operands = 1 : i64, tpu.core_type = #tpu.core_type<tc>} {
    %c0 = arith.constant 0 : index
    %c0_0 = arith.constant 0 : index
    %0 = vector.load %arg0[%c0, %c0_0] : memref<16x16xbf16, #tpu.memory_space<vmem>>, vector<16x16xbf16>
    %c0_1 = arith.constant 0 : index
    %c0_2 = arith.constant 0 : index
    %1 = vector.load %arg1[%c0_1, %c0_2] : memref<16x64xbf16, #tpu.memory_space<vmem>>, vector<16x64xbf16>
    %c0_3 = arith.constant 0 : index
    %c0_4 = arith.constant 0 : index
    %2 = vector.load %arg8[%c0_3, %c0_4] : memref<16x256xbf16, #tpu.memory_space<vmem>>, vector<16x64xbf16>
    tpu.vector_store %arg8[%c0_3, %c0_4], %1 {strides = array<i32>} : memref<16x256xbf16, #tpu.memory_space<vmem>>, vector<16x64xbf16>,
    %cst = arith.constant dense<0.000000e+00> : vector<16x64xf32>
    %3 = tpu.matmul %0, %1, %cst {dimension_numbers = #tpu.dot_dimension_numbers<[1], [0], [0], [1], [0, 0, 1, 1], [], []>} : vector<16x16xbf16>, vector<16x64xbf16>, vector<16x64xf32> -> vector<16x64xf32>
    %4 = arith.truncf %3 : vector<16x64xf32> to vector<16x64xbf16>
    %c0_5 = arith.constant 0 : index
    %c64 = arith.constant 64 : index
    %5 = vector.load %arg8[%c0_5, %c64] : memref<16x256xbf16, #tpu.memory_space<vmem>>, vector<16x64xbf16>
    tpu.vector_store %arg8[%c0_5, %c64], %4 {strides = array<i32>} : memref<16x256xbf16, #tpu.memory_space<vmem>>, vector<16x64xbf16>,
    %cst_6 = arith.constant dense<0.000000e+00> : vector<16x64xf32>
    %6 = tpu.matmul %0, %4, %cst_6 {dimension_numbers = #tpu.dot_dimension_numbers<[1], [0], [0], [1], [0, 0, 1, 1], [], []>} : vector<16x16xbf16>, vector<16x64xbf16>, vector<16x64xf32> -> vector<16x64xf32>
    %7 = arith.truncf %6 : vector<16x64xf32> to vector<16x64xbf16>
    %c0_7 = arith.constant 0 : index
    %c128 = arith.constant 128 : index
    %8 = vector.load %arg8[%c0_7, %c128] : memref<16x256xbf16, #tpu.memory_space<vmem>>, vector<16x64xbf16>
    tpu.vector_store %arg8[%c0_7, %c128], %7 {strides = array<i32>} : memref<16x256xbf16, #tpu.memory_space<vmem>>, vector<16x64xbf16>,
    %cst_8 = arith.constant dense<0.000000e+00> : vector<16x64xf32>
    %9 = tpu.matmul %0, %7, %cst_8 {dimension_numbers = #tpu.dot_dimension_numbers<[1], [0], [0], [1], [0, 0, 1, 1], [], []>} : vector<16x16xbf16>, vector<16x64xbf16>, vector<16x64xf32> -> vector<16x64xf32>
    %10 = arith.truncf %9 : vector<16x64xf32> to vector<16x64xbf16>
    %c0_9 = arith.constant 0 : index
    %c192 = arith.constant 192 : index
    %11 = vector.load %arg8[%c0_9, %c192] : memref<16x256xbf16, #tpu.memory_space<vmem>>, vector<16x64xbf16>
    tpu.vector_store %arg8[%c0_9, %c192], %10 {strides = array<i32>} : memref<16x256xbf16, #tpu.memory_space<vmem>>, vector<16x64xbf16>,
    %c0_10 = arith.constant 0 : index
    %c0_11 = arith.constant 0 : index
    %12 = vector.load %arg8[%c0_10, %c0_11] : memref<16x256xbf16, #tpu.memory_space<vmem>>, vector<16x256xbf16>
    %c0_12 = arith.constant 0 : index
    %c0_13 = arith.constant 0 : index
    %c0_14 = arith.constant 0 : index
    %13 = vector.load %arg2[%c0_12, %c0_13, %c0_14] : memref<4x256x64xbf16, #tpu.memory_space<vmem>>, vector<1x256x64xbf16>
    %14 = vector.shape_cast %13 : vector<1x256x64xbf16> to vector<256x64xbf16>
    %cst_15 = arith.constant dense<0.000000e+00> : vector<16x64xf32>
    %15 = tpu.matmul %12, %14, %cst_15 {dimension_numbers = #tpu.dot_dimension_numbers<[1], [0], [0], [1], [0, 0, 1, 1], [], []>} : vector<16x256xbf16>, vector<256x64xbf16>, vector<16x64xf32> -> vector<16x64xf32>
    %c0_16 = arith.constant 0 : index
    %c0_17 = arith.constant 0 : index
    %c0_18 = arith.constant 0 : index
    %16 = vector.load %arg3[%c0_16, %c0_17, %c0_18] : memref<4x1x64xf32, #tpu.memory_space<vmem>>, vector<1x1x64xf32>
    %17 = vector.shape_cast %16 : vector<1x1x64xf32> to vector<1x64xf32>
    %18 = vector.broadcast %17 : vector<1x64xf32> to vector<16x64xf32>
    %19 = arith.addf %15, %18 : vector<16x64xf32>
    %20 = arith.truncf %19 : vector<16x64xf32> to vector<16x64xbf16>
    %c0_19 = arith.constant 0 : index
    %c0_20 = arith.constant 0 : index
    %21 = vector.load %arg8[%c0_19, %c0_20] : memref<16x256xbf16, #tpu.memory_space<vmem>>, vector<16x64xbf16>
    tpu.vector_store %arg8[%c0_19, %c0_20], %20 {strides = array<i32>} : memref<16x256xbf16, #tpu.memory_space<vmem>>, vector<16x64xbf16>,
    %cst_21 = arith.constant dense<0.000000e+00> : vector<16x64xf32>
    %22 = tpu.matmul %0, %20, %cst_21 {dimension_numbers = #tpu.dot_dimension_numbers<[1], [0], [0], [1], [0, 0, 1, 1], [], []>} : vector<16x16xbf16>, vector<16x64xbf16>, vector<16x64xf32> -> vector<16x64xf32>
    %23 = arith.truncf %22 : vector<16x64xf32> to vector<16x64xbf16>
    %c0_22 = arith.constant 0 : index
    %c64_23 = arith.constant 64 : index
    %24 = vector.load %arg8[%c0_22, %c64_23] : memref<16x256xbf16, #tpu.memory_space<vmem>>, vector<16x64xbf16>
    tpu.vector_store %arg8[%c0_22, %c64_23], %23 {strides = array<i32>} : memref<16x256xbf16, #tpu.memory_space<vmem>>, vector<16x64xbf16>,
    %cst_24 = arith.constant dense<0.000000e+00> : vector<16x64xf32>
    %25 = tpu.matmul %0, %23, %cst_24 {dimension_numbers = #tpu.dot_dimension_numbers<[1], [0], [0], [1], [0, 0, 1, 1], [], []>} : vector<16x16xbf16>, vector<16x64xbf16>, vector<16x64xf32> -> vector<16x64xf32>
    %26 = arith.truncf %25 : vector<16x64xf32> to vector<16x64xbf16>
    %c0_25 = arith.constant 0 : index
    %c128_26 = arith.constant 128 : index
    %27 = vector.load %arg8[%c0_25, %c128_26] : memref<16x256xbf16, #tpu.memory_space<vmem>>, vector<16x64xbf16>
    tpu.vector_store %arg8[%c0_25, %c128_26], %26 {strides = array<i32>} : memref<16x256xbf16, #tpu.memory_space<vmem>>, vector<16x64xbf16>,
    %cst_27 = arith.constant dense<0.000000e+00> : vector<16x64xf32>
    %28 = tpu.matmul %0, %26, %cst_27 {dimension_numbers = #tpu.dot_dimension_numbers<[1], [0], [0], [1], [0, 0, 1, 1], [], []>} : vector<16x16xbf16>, vector<16x64xbf16>, vector<16x64xf32> -> vector<16x64xf32>
    %29 = arith.truncf %28 : vector<16x64xf32> to vector<16x64xbf16>
    %c0_28 = arith.constant 0 : index
    %c192_29 = arith.constant 192 : index
    %30 = vector.load %arg8[%c0_28, %c192_29] : memref<16x256xbf16, #tpu.memory_space<vmem>>, vector<16x64xbf16>
    tpu.vector_store %arg8[%c0_28, %c192_29], %29 {strides = array<i32>} : memref<16x256xbf16, #tpu.memory_space<vmem>>, vector<16x64xbf16>,
    %c0_30 = arith.constant 0 : index
    %c0_31 = arith.constant 0 : index
    %31 = vector.load %arg8[%c0_30, %c0_31] : memref<16x256xbf16, #tpu.memory_space<vmem>>, vector<16x256xbf16>
    %c1 = arith.constant 1 : index
    %c0_32 = arith.constant 0 : index
    %c0_33 = arith.constant 0 : index
    %32 = vector.load %arg2[%c1, %c0_32, %c0_33] : memref<4x256x64xbf16, #tpu.memory_space<vmem>>, vector<1x256x64xbf16>
    %33 = vector.shape_cast %32 : vector<1x256x64xbf16> to vector<256x64xbf16>
    %cst_34 = arith.constant dense<0.000000e+00> : vector<16x64xf32>
    %34 = tpu.matmul %31, %33, %cst_34 {dimension_numbers = #tpu.dot_dimension_numbers<[1], [0], [0], [1], [0, 0, 1, 1], [], []>} : vector<16x256xbf16>, vector<256x64xbf16>, vector<16x64xf32> -> vector<16x64xf32>
    %c1_35 = arith.constant 1 : index
    %c0_36 = arith.constant 0 : index
    %c0_37 = arith.constant 0 : index
    %35 = vector.load %arg3[%c1_35, %c0_36, %c0_37] : memref<4x1x64xf32, #tpu.memory_space<vmem>>, vector<1x1x64xf32>
    %36 = vector.shape_cast %35 : vector<1x1x64xf32> to vector<1x64xf32>
    %37 = vector.broadcast %36 : vector<1x64xf32> to vector<16x64xf32>
    %38 = arith.addf %34, %37 : vector<16x64xf32>
    %39 = arith.truncf %38 : vector<16x64xf32> to vector<16x64xbf16>
    %c0_38 = arith.constant 0 : index
    %c0_39 = arith.constant 0 : index
    %40 = vector.load %arg8[%c0_38, %c0_39] : memref<16x256xbf16, #tpu.memory_space<vmem>>, vector<16x64xbf16>
    tpu.vector_store %arg8[%c0_38, %c0_39], %39 {strides = array<i32>} : memref<16x256xbf16, #tpu.memory_space<vmem>>, vector<16x64xbf16>,
    %cst_40 = arith.constant dense<0.000000e+00> : vector<16x64xf32>
    %41 = tpu.matmul %0, %39, %cst_40 {dimension_numbers = #tpu.dot_dimension_numbers<[1], [0], [0], [1], [0, 0, 1, 1], [], []>} : vector<16x16xbf16>, vector<16x64xbf16>, vector<16x64xf32> -> vector<16x64xf32>
    %42 = arith.truncf %41 : vector<16x64xf32> to vector<16x64xbf16>
    %c0_41 = arith.constant 0 : index
    %c64_42 = arith.constant 64 : index
    %43 = vector.load %arg8[%c0_41, %c64_42] : memref<16x256xbf16, #tpu.memory_space<vmem>>, vector<16x64xbf16>
    tpu.vector_store %arg8[%c0_41, %c64_42], %42 {strides = array<i32>} : memref<16x256xbf16, #tpu.memory_space<vmem>>, vector<16x64xbf16>,
    %cst_43 = arith.constant dense<0.000000e+00> : vector<16x64xf32>
    %44 = tpu.matmul %0, %42, %cst_43 {dimension_numbers = #tpu.dot_dimension_numbers<[1], [0], [0], [1], [0, 0, 1, 1], [], []>} : vector<16x16xbf16>, vector<16x64xbf16>, vector<16x64xf32> -> vector<16x64xf32>
    %45 = arith.truncf %44 : vector<16x64xf32> to vector<16x64xbf16>
    %c0_44 = arith.constant 0 : index
    %c128_45 = arith.constant 128 : index
    %46 = vector.load %arg8[%c0_44, %c128_45] : memref<16x256xbf16, #tpu.memory_space<vmem>>, vector<16x64xbf16>
    tpu.vector_store %arg8[%c0_44, %c128_45], %45 {strides = array<i32>} : memref<16x256xbf16, #tpu.memory_space<vmem>>, vector<16x64xbf16>,
    %cst_46 = arith.constant dense<0.000000e+00> : vector<16x64xf32>
    %47 = tpu.matmul %0, %45, %cst_46 {dimension_numbers = #tpu.dot_dimension_numbers<[1], [0], [0], [1], [0, 0, 1, 1], [], []>} : vector<16x16xbf16>, vector<16x64xbf16>, vector<16x64xf32> -> vector<16x64xf32>
    %48 = arith.truncf %47 : vector<16x64xf32> to vector<16x64xbf16>
    %c0_47 = arith.constant 0 : index
    %c192_48 = arith.constant 192 : index
    %49 = vector.load %arg8[%c0_47, %c192_48] : memref<16x256xbf16, #tpu.memory_space<vmem>>, vector<16x64xbf16>
    tpu.vector_store %arg8[%c0_47, %c192_48], %48 {strides = array<i32>} : memref<16x256xbf16, #tpu.memory_space<vmem>>, vector<16x64xbf16>,
    %c0_49 = arith.constant 0 : index
    %c0_50 = arith.constant 0 : index
    %50 = vector.load %arg8[%c0_49, %c0_50] : memref<16x256xbf16, #tpu.memory_space<vmem>>, vector<16x256xbf16>
    %c2 = arith.constant 2 : index
    %c0_51 = arith.constant 0 : index
    %c0_52 = arith.constant 0 : index
    %51 = vector.load %arg2[%c2, %c0_51, %c0_52] : memref<4x256x64xbf16, #tpu.memory_space<vmem>>, vector<1x256x64xbf16>
    %52 = vector.shape_cast %51 : vector<1x256x64xbf16> to vector<256x64xbf16>
    %cst_53 = arith.constant dense<0.000000e+00> : vector<16x64xf32>
    %53 = tpu.matmul %50, %52, %cst_53 {dimension_numbers = #tpu.dot_dimension_numbers<[1], [0], [0], [1], [0, 0, 1, 1], [], []>} : vector<16x256xbf16>, vector<256x64xbf16>, vector<16x64xf32> -> vector<16x64xf32>
    %c2_54 = arith.constant 2 : index
    %c0_55 = arith.constant 0 : index
    %c0_56 = arith.constant 0 : index
    %54 = vector.load %arg3[%c2_54, %c0_55, %c0_56] : memref<4x1x64xf32, #tpu.memory_space<vmem>>, vector<1x1x64xf32>
    %55 = vector.shape_cast %54 : vector<1x1x64xf32> to vector<1x64xf32>
    %56 = vector.broadcast %55 : vector<1x64xf32> to vector<16x64xf32>
    %57 = arith.addf %53, %56 : vector<16x64xf32>
    %58 = arith.truncf %57 : vector<16x64xf32> to vector<16x64xbf16>
    %c0_57 = arith.constant 0 : index
    %c0_58 = arith.constant 0 : index
    %59 = vector.load %arg8[%c0_57, %c0_58] : memref<16x256xbf16, #tpu.memory_space<vmem>>, vector<16x64xbf16>
    tpu.vector_store %arg8[%c0_57, %c0_58], %58 {strides = array<i32>} : memref<16x256xbf16, #tpu.memory_space<vmem>>, vector<16x64xbf16>,
    %cst_59 = arith.constant dense<0.000000e+00> : vector<16x64xf32>
    %60 = tpu.matmul %0, %58, %cst_59 {dimension_numbers = #tpu.dot_dimension_numbers<[1], [0], [0], [1], [0, 0, 1, 1], [], []>} : vector<16x16xbf16>, vector<16x64xbf16>, vector<16x64xf32> -> vector<16x64xf32>
    %61 = arith.truncf %60 : vector<16x64xf32> to vector<16x64xbf16>
    %c0_60 = arith.constant 0 : index
    %c64_61 = arith.constant 64 : index
    %62 = vector.load %arg8[%c0_60, %c64_61] : memref<16x256xbf16, #tpu.memory_space<vmem>>, vector<16x64xbf16>
    tpu.vector_store %arg8[%c0_60, %c64_61], %61 {strides = array<i32>} : memref<16x256xbf16, #tpu.memory_space<vmem>>, vector<16x64xbf16>,
    %cst_62 = arith.constant dense<0.000000e+00> : vector<16x64xf32>
    %63 = tpu.matmul %0, %61, %cst_62 {dimension_numbers = #tpu.dot_dimension_numbers<[1], [0], [0], [1], [0, 0, 1, 1], [], []>} : vector<16x16xbf16>, vector<16x64xbf16>, vector<16x64xf32> -> vector<16x64xf32>
    %64 = arith.truncf %63 : vector<16x64xf32> to vector<16x64xbf16>
    %c0_63 = arith.constant 0 : index
    %c128_64 = arith.constant 128 : index
    %65 = vector.load %arg8[%c0_63, %c128_64] : memref<16x256xbf16, #tpu.memory_space<vmem>>, vector<16x64xbf16>
    tpu.vector_store %arg8[%c0_63, %c128_64], %64 {strides = array<i32>} : memref<16x256xbf16, #tpu.memory_space<vmem>>, vector<16x64xbf16>,
    %cst_65 = arith.constant dense<0.000000e+00> : vector<16x64xf32>
    %66 = tpu.matmul %0, %64, %cst_65 {dimension_numbers = #tpu.dot_dimension_numbers<[1], [0], [0], [1], [0, 0, 1, 1], [], []>} : vector<16x16xbf16>, vector<16x64xbf16>, vector<16x64xf32> -> vector<16x64xf32>
    %67 = arith.truncf %66 : vector<16x64xf32> to vector<16x64xbf16>
    %c0_66 = arith.constant 0 : index
    %c192_67 = arith.constant 192 : index
    %68 = vector.load %arg8[%c0_66, %c192_67] : memref<16x256xbf16, #tpu.memory_space<vmem>>, vector<16x64xbf16>
    tpu.vector_store %arg8[%c0_66, %c192_67], %67 {strides = array<i32>} : memref<16x256xbf16, #tpu.memory_space<vmem>>, vector<16x64xbf16>,
    %c0_68 = arith.constant 0 : index
    %c0_69 = arith.constant 0 : index
    %69 = vector.load %arg8[%c0_68, %c0_69] : memref<16x256xbf16, #tpu.memory_space<vmem>>, vector<16x256xbf16>
    %c3 = arith.constant 3 : index
    %c0_70 = arith.constant 0 : index
    %c0_71 = arith.constant 0 : index
    %70 = vector.load %arg2[%c3, %c0_70, %c0_71] : memref<4x256x64xbf16, #tpu.memory_space<vmem>>, vector<1x256x64xbf16>
    %71 = vector.shape_cast %70 : vector<1x256x64xbf16> to vector<256x64xbf16>
    %cst_72 = arith.constant dense<0.000000e+00> : vector<16x64xf32>
    %72 = tpu.matmul %69, %71, %cst_72 {dimension_numbers = #tpu.dot_dimension_numbers<[1], [0], [0], [1], [0, 0, 1, 1], [], []>} : vector<16x256xbf16>, vector<256x64xbf16>, vector<16x64xf32> -> vector<16x64xf32>
    %c3_73 = arith.constant 3 : index
    %c0_74 = arith.constant 0 : index
    %c0_75 = arith.constant 0 : index
    %73 = vector.load %arg3[%c3_73, %c0_74, %c0_75] : memref<4x1x64xf32, #tpu.memory_space<vmem>>, vector<1x1x64xf32>
    %74 = vector.shape_cast %73 : vector<1x1x64xf32> to vector<1x64xf32>
    %75 = vector.broadcast %74 : vector<1x64xf32> to vector<16x64xf32>
    %76 = arith.addf %72, %75 : vector<16x64xf32>
    %77 = arith.truncf %76 : vector<16x64xf32> to vector<16x64xbf16>
    %c0_76 = arith.constant 0 : index
    %c0_77 = arith.constant 0 : index
    %78 = vector.load %arg4[%c0_76, %c0_77] : memref<8x16xbf16, #tpu.memory_space<vmem>>, vector<8x16xbf16>
    %cst_78 = arith.constant dense<0.000000e+00> : vector<8x64xf32>
    %79 = tpu.matmul %78, %77, %cst_78 {dimension_numbers = #tpu.dot_dimension_numbers<[1], [0], [0], [1], [0, 0, 1, 1], [], []>} : vector<8x16xbf16>, vector<16x64xbf16>, vector<8x64xf32> -> vector<8x64xf32>
    %80 = arith.truncf %79 : vector<8x64xf32> to vector<8x64xbf16>
    %c0_79 = arith.constant 0 : index
    %c0_80 = arith.constant 0 : index
    %81 = vector.load %arg5[%c0_79, %c0_80] : memref<64x128xbf16, #tpu.memory_space<vmem>>, vector<64x128xbf16>
    %cst_81 = arith.constant dense<0.000000e+00> : vector<8x128xf32>
    %82 = tpu.matmul %80, %81, %cst_81 {dimension_numbers = #tpu.dot_dimension_numbers<[1], [0], [0], [1], [0, 0, 1, 1], [], []>} : vector<8x64xbf16>, vector<64x128xbf16>, vector<8x128xf32> -> vector<8x128xf32>
    %c0_82 = arith.constant 0 : index
    %c0_83 = arith.constant 0 : index
    %83 = vector.load %arg6[%c0_82, %c0_83] : memref<1x128xf32, #tpu.memory_space<vmem>>, vector<1x128xf32>
    %84 = vector.broadcast %83 : vector<1x128xf32> to vector<8x128xf32>
    %85 = arith.addf %82, %84 : vector<8x128xf32>
    %c0_84 = arith.constant 0 : index
    %c0_85 = arith.constant 0 : index
    %86 = vector.load %arg7[%c0_84, %c0_85] : memref<8x128xf32, #tpu.memory_space<vmem>>, vector<8x128xf32>
    tpu.vector_store %arg7[%c0_84, %c0_85], %85 {strides = array<i32>} : memref<8x128xf32, #tpu.memory_space<vmem>>, vector<8x128xf32>,
    return
  }
}

</mosaic_0001>

<bundles_post_ra>
// kernel: tpu_custom_call.1
= control target key start
LH: loop header
LB: loop body
LE: loop exit
PB: predicated region body
PF: predicated region fallthrough
CT: control target
= control target key end

     0   :  { %12 = vsyncpa [#allocation4], 0  ;;  %s2401_s0 = inlined_call_operand.hbm [shape: bf16[16,16], index: 0, kind: input, shape index: {}]   ;;  %s2402_s1 = inlined_call_operand.hbm [shape: bf16[16,64], index: 1, kind: input, shape index: {}]   ;;  %s2403_s2 = inlined_call_operand.hbm [shape: bf16[4,256,64], index: 2, kind: input, shape index: {}]   ;;  %s2404_s3 = inlined_call_operand.hbm [shape: f32[4,1,64], index: 3, kind: input, shape index: {}]   ;;  %s2405_s4 = inlined_call_operand.hbm [shape: bf16[8,16], index: 4, kind: input, shape index: {}]   ;;  %s2406_s5 = inlined_call_operand.hbm [shape: bf16[64,128], index: 5, kind: input, shape index: {}]   ;;  %s2407_s6 = inlined_call_operand.hbm [shape: f32[1,128], index: 6, kind: input, shape index: {}]   ;;  %s2408_s7 = inlined_call_operand.hbm [shape: f32[8,128], index: 7, kind: output, shape index: {}]  }
   0x1   :  { %13 = vsyncpa [#allocation7], 0 }
   0x2   :  { %14 = vsyncpa [#allocation10], 0 }
   0x3   :  { %15 = vsyncpa [#allocation13], 0 }
   0x4   :  { %16 = vsyncpa [#allocation5], 0  ;;  %s2128_s24 = smov [#allocation6]   ;;  %s2129_s26 = smov [#allocation9]  }
   0x5   :  { %s34_s25 = sshll.u32 %s2128_s24, 4  ;;  %s58_s27 = sshll.u32 %s2129_s26, 4  ;;  %s35_s25 = int_to_ptr.vmem [resolvable:$true] %s34_s25  ;;  %s2182_s27 = int_to_ptr.vmem [resolvable:$true] %s58_s27 }
   0x6   :  { %s1942_s30 = scalar_lea.hbm %s2402_s1, 128 }
   0x7   :  { %p1943_p0 = scmp.ne.s32.totalorder %s2402_s1, %s1942_s30  ;;  %p1946_p1 = scmp.lt.u32.totalorder %s1942_s30, %s2402_s1 }
   0x9   :  { %p1948_p2 = pnand %p1946_p1, %p1943_p0 }
   0xb   :  { %1951 = shalt.err (!%p1948_p2)
}
   0xc   :  { %s1952_s12 = scalar_lea.vmem %s35_s25, 128  ;;  %p1957_p4 = scmp.lt.s32.totalorder %s35_s25, %s35_s25 }
   0xd   :  { %p1953_p3 = scmp.ne.s32.totalorder %s35_s25, %s1952_s12  ;;  %p1958_p5 = scmp.lt.s32.totalorder %s1952_s12, %s1952_s12 }
   0xf   :  { %p1959_p6 = por %p1958_p5, %p1957_p4 }
  0x11   :  { %p1960_p7 = pnand %p1959_p6, %p1953_p3 }
  0x13   :  { %1963 = shalt.err (!%p1960_p7)
}
  0x14   :  { %s2130_s13 = smov 64   ;;  %s2131_s14 = smov 4  }
  0x15   :  { %40 = dma.hbm_to_vmem [thread:$0]  %s2402_s1, 128, %s35_s25, [#allocation7], %s2130_s13, %s2130_s13, %s2131_s14  }
  0x16   :  { %s1964_s19 = scalar_lea.hbm %s2404_s3, 64 }
  0x17   :  { %p1965_p8 = scmp.ne.s32.totalorder %s2404_s3, %s1964_s19  ;;  %p1968_p9 = scmp.lt.u32.totalorder %s1964_s19, %s2404_s3 }
  0x19   :  { %p1970_p10 = pnand %p1968_p9, %p1965_p8 }
  0x1b   :  { %1973 = shalt.err (!%p1970_p10)
}
  0x1c   :  { %s1974_s24 = scalar_lea.vmem %s2182_s27, 64  ;;  %p1979_p12 = scmp.lt.s32.totalorder %s2182_s27, %s2182_s27 }
  0x1d   :  { %p1975_p11 = scmp.ne.s32.totalorder %s2182_s27, %s1974_s24  ;;  %p1980_p13 = scmp.lt.s32.totalorder %s1974_s24, %s1974_s24 }
  0x1f   :  { %p1981_p0 = por %p1980_p13, %p1979_p12 }
  0x21   :  { %p1982_p1 = pnand %p1981_p0, %p1975_p11 }
  0x23   :  { %1985 = shalt.err (!%p1982_p1)
}
  0x24   :  { %s2132_s1 = smov 16   ;;  %s2133_s25 = smov 1  }
  0x25   :  { %64 = dma.hbm_to_vmem [thread:$0]  %s2404_s3, 64, %s2182_s27, [#allocation10], %s2132_s1, %s2132_s1, %s2133_s25  }
  0x26   :  { %s2134_s29 = smov [#allocation12]   ;;  %s2135_s8 = smov [#allocation3]  }
  0x27   :  { %s80_s30 = sshll.u32 %s2134_s29, 4  ;;  %s22_s9 = sshll.u32 %s2135_s8, 4  ;;  %s81_s30 = int_to_ptr.vmem [resolvable:$true] %s80_s30  ;;  %s2216_s9 = int_to_ptr.vmem [resolvable:$true] %s22_s9 }
  0x28   :  { %s1986_s12 = scalar_lea.hbm %s2406_s5, 512 }
  0x29   :  { %p1987_p2 = scmp.ne.s32.totalorder %s2406_s5, %s1986_s12  ;;  %p1990_p3 = scmp.lt.u32.totalorder %s1986_s12, %s2406_s5 }
  0x2b   :  { %p1992_p4 = pnand %p1990_p3, %p1987_p2 }
  0x2d   :  { %1995 = shalt.err (!%p1992_p4)
}
  0x2e   :  { %s1996_s3 = scalar_lea.vmem %s81_s30, 512  ;;  %p2001_p6 = scmp.lt.s32.totalorder %s81_s30, %s81_s30 }
  0x2f   :  { %p1997_p5 = scmp.ne.s32.totalorder %s81_s30, %s1996_s3  ;;  %p2002_p7 = scmp.lt.s32.totalorder %s1996_s3, %s1996_s3 }
  0x31   :  { %p2003_p8 = por %p2002_p7, %p2001_p6 }
  0x33   :  { %p2004_p9 = pnand %p2003_p8, %p1997_p5 }
  0x35   :  { %2007 = shalt.err (!%p2004_p9)
}
  0x36   :  { %86 = dma.hbm_to_vmem [thread:$0]  %s2406_s5, 512, %s81_s30, [#allocation13], %s2130_s13, %s2130_s13, %s2131_s14  }
  0x37   :  { %s2008_s22 = scalar_lea.hbm %s2401_s0, 128 }
  0x38   :  { %p2009_p10 = scmp.ne.s32.totalorder %s2401_s0, %s2008_s22  ;;  %p2012_p11 = scmp.lt.u32.totalorder %s2008_s22, %s2401_s0 }
  0x3a   :  { %p2014_p12 = pnand %p2012_p11, %p2009_p10 }
  0x3c   :  { %2017 = shalt.err (!%p2014_p12)
}
  0x3d   :  { %s2018_s26 = scalar_lea.vmem %s2216_s9, 128  ;;  %p2023_p0 = scmp.lt.s32.totalorder %s2216_s9, %s2216_s9 }
  0x3e   :  { %p2019_p13 = scmp.ne.s32.totalorder %s2216_s9, %s2018_s26  ;;  %p2024_p1 = scmp.lt.s32.totalorder %s2018_s26, %s2018_s26 }
  0x40   :  { %p2025_p2 = por %p2024_p1, %p2023_p0 }
  0x42   :  { %p2026_p3 = pnand %p2025_p2, %p2019_p13 }
  0x44   :  { %2029 = shalt.err (!%p2026_p3)
}
  0x45   :  { %28 = dma.hbm_to_vmem [thread:$0]  %s2401_s0, 128, %s2216_s9, [#allocation4], %s2130_s13, %s2130_s13, %s2131_s14  }
  0x46   :  { %s2136_s29 = smov [#allocation8]   ;;  %s2137_s8 = smov [#allocation11]  }
  0x47   :  { %s46_s30 = sshll.u32 %s2136_s29, 4  ;;  %s71_s10 = sshll.u32 %s2137_s8, 4  ;;  %s47_s30 = int_to_ptr.vmem [resolvable:$true] %s46_s30  ;;  %s72_s10 = int_to_ptr.vmem [resolvable:$true] %s71_s10 }
  0x48   :  { %s2030_s15 = scalar_lea.hbm %s2403_s2, 8192 }
  0x49   :  { %p2031_p4 = scmp.ne.s32.totalorder %s2403_s2, %s2030_s15  ;;  %p2034_p5 = scmp.lt.u32.totalorder %s2030_s15, %s2403_s2 }
  0x4b   :  { %p2036_p6 = pnand %p2034_p5, %p2031_p4 }
  0x4d   :  { %2039 = shalt.err (!%p2036_p6)
}
  0x4e   :  { %s2040_s0 = scalar_lea.vmem %s47_s30, 8192  ;;  %p2045_p8 = scmp.lt.s32.totalorder %s47_s30, %s47_s30 }
  0x4f   :  { %p2041_p7 = scmp.ne.s32.totalorder %s47_s30, %s2040_s0  ;;  %p2046_p9 = scmp.lt.s32.totalorder %s2040_s0, %s2040_s0 }
  0x51   :  { %p2047_p10 = por %p2046_p9, %p2045_p8 }
  0x53   :  { %p2048_p11 = pnand %p2047_p10, %p2041_p7 }
  0x55   :  { %2051 = shalt.err (!%p2048_p11)
}
  0x56   :  { %52 = dma.hbm_to_vmem [thread:$0]  %s2403_s2, 8192, %s47_s30, [#allocation7], %s2130_s13, %s2130_s13, %s2131_s14  }
  0x57   :  { %s2052_s21 = scalar_lea.hbm %s2405_s4, 64 }
  0x58   :  { %p2053_p12 = scmp.ne.s32.totalorder %s2405_s4, %s2052_s21  ;;  %p2056_p13 = scmp.lt.u32.totalorder %s2052_s21, %s2405_s4 }
  0x5a   :  { %p2058_p0 = pnand %p2056_p13, %p2053_p12 }
  0x5c   :  { %2061 = shalt.err (!%p2058_p0)
}
  0x5d   :  { %s2062_s25 = scalar_lea.vmem %s72_s10, 64  ;;  %p2067_p2 = scmp.lt.s32.totalorder %s72_s10, %s72_s10 }
  0x5e   :  { %p2063_p1 = scmp.ne.s32.totalorder %s72_s10, %s2062_s25  ;;  %p2068_p3 = scmp.lt.s32.totalorder %s2062_s25, %s2062_s25 }
  0x60   :  { %p2069_p4 = por %p2068_p3, %p2067_p2 }
  0x62   :  { %p2070_p5 = pnand %p2069_p4, %p2063_p1 }
  0x64   :  { %2073 = shalt.err (!%p2070_p5)
}
  0x65   :  { %74 = dma.hbm_to_vmem [thread:$0]  %s2405_s4, 64, %s72_s10, [#allocation10]  }
  0x66   :  { %s2138_s26 = smov [#allocation14]   ;;  %s2074_s30 = scalar_lea.hbm %s2407_s6, 16 }
  0x67   :  { %s93_s5 = sshll.u32 %s2138_s26, 4  ;;  %p2075_p6 = scmp.ne.s32.totalorder %s2407_s6, %s2074_s30  ;;  %s94_s5 = int_to_ptr.vmem [resolvable:$true] %s93_s5 }
  0x68   :  { %p2078_p7 = scmp.lt.u32.totalorder %s2074_s30, %s2407_s6 }
  0x6a   :  { %p2080_p8 = pnand %p2078_p7, %p2075_p6 }
  0x6c   :  { %2083 = shalt.err (!%p2080_p8)
}
  0x6d   :  { %s2084_s16 = scalar_lea.vmem %s94_s5, 16  ;;  %s2088_s4 = scalar_lea.vmem %s94_s5, 32 }
  0x6e   :  { %p2085_p9 = scmp.ne.s32.totalorder %s94_s5, %s2084_s16  ;;  %p2089_p10 = scmp.lt.s32.totalorder %s94_s5, %s94_s5 }
  0x6f   :  { %p2090_p11 = scmp.lt.s32.totalorder %s2088_s4, %s2084_s16 }
  0x71   :  { %p2091_p12 = por %p2090_p11, %p2089_p10 }
  0x73   :  { %p2092_p13 = pnand %p2091_p12, %p2085_p9 }
  0x75   :  { %2095 = shalt.err (!%p2092_p13)
}
  0x76   :  { %96 = dma.hbm_to_vmem [thread:$0]  %s2407_s6, 16, %s94_s5, [#allocation13]  }
  0x77   :  { %2118 = dma.done.wait [#allocation4], 128  }
  0x78   :  { %2119 = vsyncadd [#allocation4], 4294967168 }
  0x79   :  { %2120 = dma.done.wait [#allocation7], 8320  }
  0x7a   :  { %2121 = vsyncadd [#allocation7], 4294958976 }
  0x7b   :  { %2122 = dma.done.wait [#allocation10], 128  }
  0x7c   :  { %2123 = vsyncadd [#allocation10], 4294967168 }
  0x7d   :  { %2124 = dma.done.wait [#allocation13], 528  }
  0x7e   :  { %2125 = vsyncadd [#allocation13], 4294966768  ;;  %v2139_v0 = vmov 0.0   ;;  %vm2140_vm0 = vmmov 0   ;;  %v1872_v1 = vld [vmem:[#allocation6] sm:$0xff]   ;;  %vm129_vm1 = vcmask 523264  }
  0x7f   :  { %1768 = vmatprep.subr.bf16.mxu0 %v2139_v0  ;;  %1770 = vmatprep.mubr.msk.bf16.mxu0 %vm2140_vm0, %v2139_v0  ;;  %v2298_v2 = vld [vmem:[#allocation3] sm:$0xff]   ;;  %vm136_vm2 = vcmask 130048   ;;  %130 = vst.msk [vmem:[#allocation2] sm:$0xff] %vm129_vm1, %v1872_v1  ;;  %v1874_v13 = vld [vmem:[#allocation8 + $0x40] sm:$0xff]   ;;  %v1876_v15 = vld [vmem:[#allocation8 + $0x48] sm:$0xff]   ;;  %vm186_vm3 = vcmask 1048064  }
  0x80   :  { %1774 = vmatprep.subr.bf16.mxu1 %v2139_v0  ;;  %1776 = vmatprep.mubr.msk.bf16.mxu1 %vm2140_vm0, %v2139_v0  ;;  %v1875_v14 = vld [vmem:[#allocation8] sm:$0xff]   ;;  %v1877_v16 = vld [vmem:[#allocation8 + $0x8] sm:$0xff]   ;;  %v1878_v17 = vld [vmem:[#allocation8 + $0x50] sm:$0xff]   ;;  %s2141_s6 = smov [#allocation15]  }
  0x81   :  { %1769 = vmatpush3.bf16.msra.mxu0 %v1872_v1  ;;  %v1879_v18 = vld [vmem:[#allocation8 + $0x10] sm:$0xff]   ;;  %v1880_v19 = vld [vmem:[#allocation8 + $0x58] sm:$0xff]   ;;  %v1882_v21 = vld [vmem:[#allocation8 + $0x60] sm:$0xff]  }
  0x82   :  { %1780 = vmatprep.subr.bf16.mxu0 %v2139_v0  ;;  %v1881_v20 = vld [vmem:[#allocation8 + $0x18] sm:$0xff]   ;;  %v1883_v22 = vld [vmem:[#allocation8 + $0x20] sm:$0xff]   ;;  %v1884_v23 = vld [vmem:[#allocation8 + $0x68] sm:$0xff]  }
  0x83   :  { %v1885_v24 = vld [vmem:[#allocation8 + $0x28] sm:$0xff]   ;;  %v1886_v25 = vld [vmem:[#allocation8 + $0x70] sm:$0xff]   ;;  %v1888_v27 = vld [vmem:[#allocation8 + $0x78] sm:$0xff]  }
  0x84   :  { %1771 = vmatmul.mubr.msk.bf16.vlgmr.msra.gmra.mrb[0].mxu0 %vm136_vm2, %v2298_v2  ;;  %v1887_v26 = vld [vmem:[#allocation8 + $0x30] sm:$0xff]   ;;  %v1889_v28 = vld [vmem:[#allocation8 + $0x38] sm:$0xff]   ;;  %v1565_v42 = vld [vmem:[#allocation9] ss:$0 sm:$0xff] }
  0x85   :  { %1782 = vmatprep.mubr.msk.bf16.mxu0 %vm2140_vm0, %v2139_v0  ;;  %v1890_v58 = vld [vmem:[#allocation8 + $0xc0] sm:$0xff]   ;;  %v1892_v60 = vld [vmem:[#allocation8 + $0xc8] sm:$0xff]   ;;  %v1894_v62 = vld [vmem:[#allocation8 + $0xd0] sm:$0xff]  }
  0x86   :  { %v1891_v59 = vld [vmem:[#allocation8 + $0x80] sm:$0xff]   ;;  %v1893_v61 = vld [vmem:[#allocation8 + $0x88] sm:$0xff]   ;;  %v1895_v63 = vld [vmem:[#allocation8 + $0x90] sm:$0xff]  }
  0x87   :  { %v1896_v1 = vld [vmem:[#allocation8 + $0xd8] sm:$0xff]  }
 0x157   :  { %v174_v3 = vpop.f32.mrb[0].mxu0 }
 0x158   :  { %v1772_v4 = vpop.f32.mrb[1].mxu0 }
 0x159   :  { %v177_v5 = vpop.f32.mrb[2].mxu0  ;;  %v1898_v4 = vld [vmem:[#allocation8 + $0xe0] sm:$0xff]  }
 0x15a   :  { %v181_v6 = vpack.c.bf16 %v177_v5, %v174_v3  ;;  %v1773_v7 = vpop.f32.mrb[3].mxu0  ;;  %v1897_v3 = vld [vmem:[#allocation8 + $0x98] sm:$0xff]   ;;  %v1899_v5 = vld [vmem:[#allocation8 + $0xa0] sm:$0xff]  }
 0x15b   :  { %v1901_v7 = vld [vmem:[#allocation8 + $0xa8] sm:$0xff]  }
 0x15c   :  { %1775 = vmatpush3.bf16.msra.mxu1 %v181_v6 }
 0x15d   :  { %1655 = vmatprep.subr.bf16.mxu1 %v1874_v13 }
 0x15f   :  { %1777 = vmatmul.mubr.msk.bf16.vlgmr.msra.gmra.mrb[0].mxu1 %vm136_vm2, %v2298_v2 }
 0x160   :  { %1656 = vmatpush3.bf16.msra.mxu1 %v1875_v14 }
 0x161   :  { %1657 = vmatprep.subr.bf16.mxu1 %v1876_v15 }
 0x164   :  { %1658 = vmatpush3.bf16.msra.mxu1 %v1877_v16 }
 0x165   :  { %1659 = vmatprep.subr.bf16.mxu1 %v1878_v17 }
 0x168   :  { %1660 = vmatpush3.bf16.msra.mxu1 %v1879_v18 }
 0x169   :  { %1661 = vmatprep.subr.bf16.mxu1 %v1880_v19 }
 0x16c   :  { %1662 = vmatpush3.bf16.msra.mxu1 %v1881_v20 }
 0x16d   :  { %1663 = vmatprep.subr.bf16.mxu1 %v1882_v21 }
 0x170   :  { %1664 = vmatpush3.bf16.msra.mxu1 %v1883_v22 }
 0x171   :  { %1665 = vmatprep.subr.bf16.mxu1 %v1884_v23 }
 0x174   :  { %1666 = vmatpush3.bf16.msra.mxu1 %v1885_v24 }
 0x175   :  { %1667 = vmatprep.subr.bf16.mxu1 %v1886_v25  ;;  %v1585_v25 = vld [vmem:[#allocation9 + $0x1] ss:$0 sm:$0xff] }
 0x178   :  { %1668 = vmatpush3.bf16.msra.mxu1 %v1887_v26 }
 0x179   :  { %1669 = vmatprep.subr.bf16.mxu1 %v1888_v27 }
 0x17c   :  { %1670 = vmatpush3.bf16.msra.mxu1 %v1889_v28 }
 0x17d   :  { %1804 = vmatprep.subr.bf16.mxu1 %v2139_v0 }
 0x232   :  { %v222_v8 = vpop.f32.mrb[0].mxu1 }
 0x233   :  { %v1778_v9 = vpop.f32.mrb[1].mxu1 }
 0x234   :  { %v225_v10 = vpop.f32.mrb[2].mxu1  ;;  %v1903_v9 = vld [vmem:[#allocation8 + $0xb0] sm:$0xff]  }
 0x235   :  { %v229_v11 = vpack.c.bf16 %v225_v10, %v222_v8  ;;  %v1779_v12 = vpop.f32.mrb[3].mxu1  ;;  %v1902_v8 = vld [vmem:[#allocation8 + $0xf0] sm:$0xff]   ;;  %v1904_v10 = vld [vmem:[#allocation8 + $0xf8] sm:$0xff]  }
 0x237   :  { %230 = vst.msk [vmem:[#allocation2 + $0x8] sm:$0xff] %vm129_vm1, %v229_v11  ;;  %1781 = vmatpush3.bf16.msra.mxu0 %v229_v11  ;;  %v1905_v11 = vld [vmem:[#allocation8 + $0xb8] sm:$0xff]  }
 0x238   :  { %1786 = vmatprep.subr.bf16.mxu0 %v2139_v0 }
 0x23a   :  { %1783 = vmatmul.mubr.msk.bf16.vlgmr.msra.gmra.mrb[4].mxu0 %vm136_vm2, %v2298_v2 }
 0x23b   :  { %1788 = vmatprep.mubr.msk.bf16.mxu0 %vm2140_vm0, %v2139_v0 }
 0x30d   :  { %v265_v29 = vpop.f32.mrb[4].mxu0 }
 0x30e   :  { %v1784_v30 = vpop.f32.mrb[5].mxu0 }
 0x30f   :  { %v268_v31 = vpop.f32.mrb[6].mxu0 }
 0x310   :  { %v1785_v32 = vpop.f32.mrb[7].mxu0  ;;  %v272_v33 = vpack.c.bf16 %v268_v31, %v265_v29 }
 0x312   :  { %274 = vrot.lane.b32.xlu0 %v272_v33, %s2130_s13 }
 0x316   :  { %183 = vrot.lane.b32.xlu0 %v181_v6, %s2130_s13  ;;  %v1900_v6 = vld [vmem:[#allocation8 + $0xe8] sm:$0xff]  }
 0x384   :  { %v275_v34 = vpop.permute.xlu0 %274 }
 0x385   :  { %277 = vst.msk [vmem:[#allocation2 + $0x8] sm:$0xff] %vm186_vm3, %v275_v34 }
 0x388   :  { %v184_v35 = vpop.permute.xlu0 %183 }
 0x389   :  { %187 = vst.msk [vmem:[#allocation2] sm:$0xff] %vm186_vm3, %v184_v35 }
 0x38c   :  { %v279_v36 = vld [vmem:[#allocation2 + $0x8] sm:$0xff] }
 0x38d   :  { %447 = vmatprep.mubr.bf16.mxu1 %v279_v36 }
 0x390   :  { %v278_v37 = vld [vmem:[#allocation2] sm:$0xff] }
 0x391   :  { %448 = vmatmul.mubr.bf16.vlgmr.msra.gmra.mrb[4].mxu1 %v278_v37 }
 0x392   :  { %1806 = vmatprep.mubr.msk.bf16.mxu1 %vm2140_vm0, %v2139_v0 }
 0x464   :  { %v1671_v38 = vpop.f32.mrb[4].mxu1 }
 0x465   :  { %v1672_v39 = vpop.f32.mrb[5].mxu1 }
 0x466   :  { %v1673_v40 = vadd.f32 %v1672_v39, %v1671_v38  ;;  %v1674_v41 = vpop.f32.mrb[6].mxu1 }
 0x467   :  { %v1675_v43 = vpop.f32.mrb[7].mxu1 }
 0x468   :  { %v1676_v44 = vadd.f32 %v1675_v43, %v1674_v41  ;;  %v450_v45 = vadd.f32 %v1673_v40, %v1565_v42  ;;  %v1907_v43 = vld [vmem:[#allocation8 + $0x100] sm:$0xff]  }
 0x46a   :  { %v453_v46 = vadd.f32 %v1676_v44, %v1565_v42  ;;  %v1906_v42 = vld [vmem:[#allocation8 + $0x140] sm:$0xff]   ;;  %v1908_v44 = vld [vmem:[#allocation8 + $0x148] sm:$0xff]  }
 0x46c   :  { %v456_v47 = vpack.c.bf16 %v453_v46, %v450_v45  ;;  %v1909_v45 = vld [vmem:[#allocation8 + $0x108] sm:$0xff]   ;;  %v1910_v46 = vld [vmem:[#allocation8 + $0x150] sm:$0xff]  }
 0x46e   :  { %457 = vst.msk [vmem:[#allocation2] sm:$0xff] %vm129_vm1, %v456_v47  ;;  %1787 = vmatpush3.bf16.msra.mxu0 %v456_v47  ;;  %v1911_v47 = vld [vmem:[#allocation8 + $0x110] sm:$0xff]  }
 0x46f   :  { %1792 = vmatprep.subr.bf16.mxu0 %v2139_v0 }
 0x471   :  { %1789 = vmatmul.mubr.msk.bf16.vlgmr.msra.gmra.mrb[8].mxu0 %vm136_vm2, %v2298_v2 }
 0x472   :  { %1794 = vmatprep.mubr.msk.bf16.mxu0 %vm2140_vm0, %v2139_v0 }
 0x544   :  { %v492_v48 = vpop.f32.mrb[8].mxu0 }
 0x545   :  { %v1790_v49 = vpop.f32.mrb[9].mxu0 }
 0x546   :  { %v495_v50 = vpop.f32.mrb[10].mxu0  ;;  %v1913_v49 = vld [vmem:[#allocation8 + $0x118] sm:$0xff]  }
 0x547   :  { %v499_v51 = vpack.c.bf16 %v495_v50, %v492_v48  ;;  %v1791_v52 = vpop.f32.mrb[11].mxu0  ;;  %v1912_v48 = vld [vmem:[#allocation8 + $0x158] sm:$0xff]   ;;  %v1914_v50 = vld [vmem:[#allocation8 + $0x160] sm:$0xff]  }
 0x548   :  { %v1916_v52 = vld [vmem:[#allocation8 + $0x168] sm:$0xff]  }
 0x549   :  { %1793 = vmatpush3.bf16.msra.mxu0 %v499_v51 }
 0x54a   :  { %1798 = vmatprep.subr.bf16.mxu0 %v2139_v0 }
 0x54c   :  { %1795 = vmatmul.mubr.msk.bf16.vlgmr.msra.gmra.mrb[12].mxu0 %vm136_vm2, %v2298_v2 }
 0x54d   :  { %1800 = vmatprep.mubr.msk.bf16.mxu0 %vm2140_vm0, %v2139_v0 }
 0x61f   :  { %v539_v53 = vpop.f32.mrb[12].mxu0 }
 0x620   :  { %v1796_v54 = vpop.f32.mrb[13].mxu0 }
 0x621   :  { %v542_v55 = vpop.f32.mrb[14].mxu0  ;;  %v1918_v54 = vld [vmem:[#allocation8 + $0x170] sm:$0xff]  }
 0x622   :  { %v546_v56 = vpack.c.bf16 %v542_v55, %v539_v53  ;;  %v1797_v57 = vpop.f32.mrb[15].mxu0  ;;  %v1917_v53 = vld [vmem:[#allocation8 + $0x128] sm:$0xff]   ;;  %v1919_v55 = vld [vmem:[#allocation8 + $0x130] sm:$0xff]  }
 0x623   :  { %v1921_v57 = vld [vmem:[#allocation8 + $0x138] sm:$0xff]  }
 0x624   :  { %547 = vst.msk [vmem:[#allocation2 + $0x8] sm:$0xff] %vm129_vm1, %v546_v56  ;;  %1799 = vmatpush3.bf16.msra.mxu0 %v546_v56  ;;  %v1920_v56 = vld [vmem:[#allocation8 + $0x178] sm:$0xff]  }
 0x625   :  { %1683 = vmatprep.subr.bf16.mxu0 %v1890_v58 }
 0x627   :  { %1801 = vmatmul.mubr.msk.bf16.vlgmr.msra.gmra.mrb[16].mxu0 %vm136_vm2, %v2298_v2 }
 0x628   :  { %1684 = vmatpush3.bf16.msra.mxu0 %v1891_v59 }
 0x629   :  { %1685 = vmatprep.subr.bf16.mxu0 %v1892_v60 }
 0x62c   :  { %1686 = vmatpush3.bf16.msra.mxu0 %v1893_v61 }
 0x62d   :  { %1687 = vmatprep.subr.bf16.mxu0 %v1894_v62 }
 0x630   :  { %1688 = vmatpush3.bf16.msra.mxu0 %v1895_v63 }
 0x631   :  { %1689 = vmatprep.subr.bf16.mxu0 %v1896_v1 }
 0x634   :  { %1690 = vmatpush3.bf16.msra.mxu0 %v1897_v3 }
 0x635   :  { %1691 = vmatprep.subr.bf16.mxu0 %v1898_v4 }
 0x638   :  { %1692 = vmatpush3.bf16.msra.mxu0 %v1899_v5 }
 0x639   :  { %1693 = vmatprep.subr.bf16.mxu0 %v1900_v6 }
 0x63c   :  { %1694 = vmatpush3.bf16.msra.mxu0 %v1901_v7 }
 0x63d   :  { %1695 = vmatprep.subr.bf16.mxu0 %v1902_v8  ;;  %v1605_v8 = vld [vmem:[#allocation9 + $0x2] ss:$0 sm:$0xff] }
 0x640   :  { %1696 = vmatpush3.bf16.msra.mxu0 %v1903_v9 }
 0x641   :  { %1697 = vmatprep.subr.bf16.mxu0 %v1904_v10 }
 0x644   :  { %1698 = vmatpush3.bf16.msra.mxu0 %v1905_v11 }
 0x645   :  { %1822 = vmatprep.subr.bf16.mxu0 %v2139_v0 }
 0x6fa   :  { %v582_v12 = vpop.f32.mrb[16].mxu0 }
 0x6fb   :  { %v1802_v13 = vpop.f32.mrb[17].mxu0 }
 0x6fc   :  { %v585_v14 = vpop.f32.mrb[18].mxu0 }
 0x6fd   :  { %v1803_v15 = vpop.f32.mrb[19].mxu0  ;;  %v589_v16 = vpack.c.bf16 %v585_v14, %v582_v12 }
 0x6ff   :  { %591 = vrot.lane.b32.xlu1 %v589_v16, %s2130_s13 }
 0x703   :  { %501 = vrot.lane.b32.xlu1 %v499_v51, %s2130_s13  ;;  %v1915_v51 = vld [vmem:[#allocation8 + $0x120] sm:$0xff]  }
 0x771   :  { %v592_v17 = vpop.permute.xlu1 %591 }
 0x772   :  { %594 = vst.msk [vmem:[#allocation2 + $0x8] sm:$0xff] %vm186_vm3, %v592_v17 }
 0x775   :  { %v502_v18 = vpop.permute.xlu1 %501 }
 0x776   :  { %504 = vst.msk [vmem:[#allocation2] sm:$0xff] %vm186_vm3, %v502_v18 }
 0x779   :  { %v596_v19 = vld [vmem:[#allocation2 + $0x8] sm:$0xff] }
 0x77a   :  { %766 = vmatprep.mubr.bf16.mxu0 %v596_v19 }
 0x77d   :  { %v595_v20 = vld [vmem:[#allocation2] sm:$0xff] }
 0x77e   :  { %767 = vmatmul.mubr.bf16.vlgmr.msra.gmra.mrb[20].mxu0 %v595_v20 }
 0x77f   :  { %1824 = vmatprep.mubr.msk.bf16.mxu0 %vm2140_vm0, %v2139_v0 }
 0x851   :  { %v1699_v21 = vpop.f32.mrb[20].mxu0 }
 0x852   :  { %v1700_v22 = vpop.f32.mrb[21].mxu0 }
 0x853   :  { %v1701_v23 = vadd.f32 %v1700_v22, %v1699_v21  ;;  %v1702_v24 = vpop.f32.mrb[22].mxu0 }
 0x854   :  { %v1703_v26 = vpop.f32.mrb[23].mxu0 }
 0x855   :  { %v1704_v27 = vadd.f32 %v1703_v26, %v1702_v24  ;;  %v769_v28 = vadd.f32 %v1701_v23, %v1585_v25  ;;  %v1923_v26 = vld [vmem:[#allocation8 + $0x180] sm:$0xff]  }
 0x857   :  { %v772_v29 = vadd.f32 %v1704_v27, %v1585_v25  ;;  %v1922_v25 = vld [vmem:[#allocation8 + $0x1c0] sm:$0xff]   ;;  %v1924_v27 = vld [vmem:[#allocation8 + $0x1c8] sm:$0xff]  }
 0x859   :  { %v775_v30 = vpack.c.bf16 %v772_v29, %v769_v28  ;;  %v1925_v28 = vld [vmem:[#allocation8 + $0x188] sm:$0xff]   ;;  %v1926_v29 = vld [vmem:[#allocation8 + $0x1d0] sm:$0xff]  }
 0x85b   :  { %776 = vst.msk [vmem:[#allocation2] sm:$0xff] %vm129_vm1, %v775_v30  ;;  %1805 = vmatpush3.bf16.msra.mxu1 %v775_v30  ;;  %v1927_v30 = vld [vmem:[#allocation8 + $0x190] sm:$0xff]  }
 0x85c   :  { %1810 = vmatprep.subr.bf16.mxu1 %v2139_v0 }
 0x85e   :  { %1807 = vmatmul.mubr.msk.bf16.vlgmr.msra.gmra.mrb[8].mxu1 %vm136_vm2, %v2298_v2 }
 0x85f   :  { %1812 = vmatprep.mubr.msk.bf16.mxu1 %vm2140_vm0, %v2139_v0 }
 0x931   :  { %v811_v31 = vpop.f32.mrb[8].mxu1 }
 0x932   :  { %v1808_v32 = vpop.f32.mrb[9].mxu1 }
 0x933   :  { %v814_v33 = vpop.f32.mrb[10].mxu1  ;;  %v1929_v32 = vld [vmem:[#allocation8 + $0x198] sm:$0xff]  }
 0x934   :  { %v818_v34 = vpack.c.bf16 %v814_v33, %v811_v31  ;;  %v1809_v35 = vpop.f32.mrb[11].mxu1  ;;  %v1928_v31 = vld [vmem:[#allocation8 + $0x1d8] sm:$0xff]   ;;  %v1930_v33 = vld [vmem:[#allocation8 + $0x1e0] sm:$0xff]  }
 0x935   :  { %v1933_v35 = vld [vmem:[#allocation8 + $0x1a8] sm:$0xff]  }
 0x936   :  { %820 = vrot.lane.b32.xlu1 %v818_v34, %s2130_s13  ;;  %1811 = vmatpush3.bf16.msra.mxu1 %v818_v34  ;;  %v1931_v34 = vld [vmem:[#allocation8 + $0x1a0] sm:$0xff]  }
 0x937   :  { %1816 = vmatprep.subr.bf16.mxu1 %v2139_v0 }
 0x939   :  { %1813 = vmatmul.mubr.msk.bf16.vlgmr.msra.gmra.mrb[12].mxu1 %vm136_vm2, %v2298_v2 }
 0x93a   :  { %1818 = vmatprep.mubr.msk.bf16.mxu1 %vm2140_vm0, %v2139_v0 }
 0x9a8   :  { %v821_v36 = vpop.permute.xlu1 %820 }
 0x9a9   :  { %823 = vst.msk [vmem:[#allocation2] sm:$0xff] %vm186_vm3, %v821_v36  ;;  %v1934_v36 = vld [vmem:[#allocation8 + $0x1f0] sm:$0xff]  }
 0x9b0   :  { %v914_v3 = vld [vmem:[#allocation2] sm:$0xff] }
 0xa0c   :  { %v858_v37 = vpop.f32.mrb[12].mxu1 }
 0xa0d   :  { %v1814_v38 = vpop.f32.mrb[13].mxu1 }
 0xa0e   :  { %v861_v39 = vpop.f32.mrb[14].mxu1  ;;  %v1936_v38 = vld [vmem:[#allocation8 + $0x1f8] sm:$0xff]  }
 0xa0f   :  { %v865_v40 = vpack.c.bf16 %v861_v39, %v858_v37  ;;  %v1815_v41 = vpop.f32.mrb[15].mxu1  ;;  %v1935_v37 = vld [vmem:[#allocation8 + $0x1b0] sm:$0xff]   ;;  %v1937_v39 = vld [vmem:[#allocation8 + $0x1b8] sm:$0xff]  }
 0xa11   :  { %866 = vst.msk [vmem:[#allocation2 + $0x8] sm:$0xff] %vm129_vm1, %v865_v40  ;;  %1817 = vmatpush3.bf16.msra.mxu1 %v865_v40 }
 0xa12   :  { %1711 = vmatprep.subr.bf16.mxu1 %v1906_v42 }
 0xa14   :  { %1819 = vmatmul.mubr.msk.bf16.vlgmr.msra.gmra.mrb[16].mxu1 %vm136_vm2, %v2298_v2 }
 0xa15   :  { %1712 = vmatpush3.bf16.msra.mxu1 %v1907_v43 }
 0xa16   :  { %1713 = vmatprep.subr.bf16.mxu1 %v1908_v44 }
 0xa19   :  { %1714 = vmatpush3.bf16.msra.mxu1 %v1909_v45 }
 0xa1a   :  { %1715 = vmatprep.subr.bf16.mxu1 %v1910_v46 }
 0xa1d   :  { %1716 = vmatpush3.bf16.msra.mxu1 %v1911_v47 }
 0xa1e   :  { %1717 = vmatprep.subr.bf16.mxu1 %v1912_v48 }
 0xa21   :  { %1718 = vmatpush3.bf16.msra.mxu1 %v1913_v49 }
 0xa22   :  { %1719 = vmatprep.subr.bf16.mxu1 %v1914_v50 }
 0xa25   :  { %1720 = vmatpush3.bf16.msra.mxu1 %v1915_v51 }
 0xa26   :  { %1721 = vmatprep.subr.bf16.mxu1 %v1916_v52  ;;  %v1625_v52 = vld [vmem:[#allocation9 + $0x3] ss:$0 sm:$0xff] }
 0xa29   :  { %1722 = vmatpush3.bf16.msra.mxu1 %v1917_v53 }
 0xa2a   :  { %1723 = vmatprep.subr.bf16.mxu1 %v1918_v54 }
 0xa2d   :  { %1724 = vmatpush3.bf16.msra.mxu1 %v1919_v55 }
 0xa2e   :  { %1725 = vmatprep.subr.bf16.mxu1 %v1920_v56 }
 0xa31   :  { %1726 = vmatpush3.bf16.msra.mxu1 %v1921_v57 }
 0xa32   :  { %1840 = vmatprep.subr.bf16.mxu1 %v2139_v0 }
 0xae7   :  { %v901_v58 = vpop.f32.mrb[16].mxu1 }
 0xae8   :  { %v1820_v59 = vpop.f32.mrb[17].mxu1 }
 0xae9   :  { %v904_v60 = vpop.f32.mrb[18].mxu1  ;;  %v1938_v59 = vld [vmem:[#allocation12] sm:$0xff]  }
 0xaea   :  { %v908_v61 = vpack.c.bf16 %v904_v60, %v901_v58  ;;  %v1821_v62 = vpop.f32.mrb[19].mxu1  ;;  %v1414_v58 = vld [vmem:[#allocation11] sm:$0xf]  ;;  %v1939_v60 = vld [vmem:[#allocation12 + $0x8] sm:$0xff]  }
 0xaeb   :  { %v1941_v62 = vld [vmem:[#allocation12 + $0x18] sm:$0xff]  }
 0xaec   :  { %910 = vrot.lane.b32.xlu0 %v908_v61, %s2130_s13  ;;  %v1940_v61 = vld [vmem:[#allocation12 + $0x10] sm:$0xff]  }
 0xb5e   :  { %v911_v63 = vpop.permute.xlu0 %910 }
 0xb5f   :  { %913 = vst.msk [vmem:[#allocation2 + $0x8] sm:$0xff] %vm186_vm3, %v911_v63 }
 0xb66   :  { %v915_v1 = vld [vmem:[#allocation2 + $0x8] sm:$0xff] }
 0xb67   :  { %1085 = vmatprep.mubr.bf16.mxu1 %v915_v1 }
 0xb68   :  { %1086 = vmatmul.mubr.bf16.vlgmr.msra.gmra.mrb[20].mxu1 %v914_v3 }
 0xb69   :  { %1842 = vmatprep.mubr.msk.bf16.mxu1 %vm2140_vm0, %v2139_v0 }
 0xc3b   :  { %v1727_v4 = vpop.f32.mrb[20].mxu1 }
 0xc3c   :  { %v1728_v5 = vpop.f32.mrb[21].mxu1 }
 0xc3d   :  { %v1729_v6 = vadd.f32 %v1728_v5, %v1727_v4  ;;  %v1730_v7 = vpop.f32.mrb[22].mxu1 }
 0xc3e   :  { %v1731_v9 = vpop.f32.mrb[23].mxu1 }
 0xc3f   :  { %v1732_v10 = vadd.f32 %v1731_v9, %v1730_v7  ;;  %v1088_v11 = vadd.f32 %v1729_v6, %v1605_v8  ;;  %v1643_v6 = vld [vmem:[#allocation14] ss:$0 sm:$0xff] }
 0xc41   :  { %v1091_v12 = vadd.f32 %v1732_v10, %v1605_v8 }
 0xc43   :  { %v1094_v13 = vpack.c.bf16 %v1091_v12, %v1088_v11 }
 0xc45   :  { %1095 = vst.msk [vmem:[#allocation2] sm:$0xff] %vm129_vm1, %v1094_v13  ;;  %1823 = vmatpush3.bf16.msra.mxu0 %v1094_v13 }
 0xc46   :  { %1828 = vmatprep.subr.bf16.mxu0 %v2139_v0 }
 0xc48   :  { %1825 = vmatmul.mubr.msk.bf16.vlgmr.msra.gmra.mrb[24].mxu0 %vm136_vm2, %v2298_v2 }
 0xc49   :  { %1830 = vmatprep.mubr.msk.bf16.mxu0 %vm2140_vm0, %v2139_v0 }
 0xd1b   :  { %v1130_v14 = vpop.f32.mrb[24].mxu0 }
 0xd1c   :  { %v1826_v15 = vpop.f32.mrb[25].mxu0 }
 0xd1d   :  { %v1133_v16 = vpop.f32.mrb[26].mxu0 }
 0xd1e   :  { %v1137_v17 = vpack.c.bf16 %v1133_v16, %v1130_v14  ;;  %v1827_v18 = vpop.f32.mrb[27].mxu0 }
 0xd20   :  { %1139 = vrot.lane.b32.xlu1 %v1137_v17, %s2130_s13  ;;  %1829 = vmatpush3.bf16.msra.mxu0 %v1137_v17 }
 0xd21   :  { %1834 = vmatprep.subr.bf16.mxu0 %v2139_v0 }
 0xd23   :  { %1831 = vmatmul.mubr.msk.bf16.vlgmr.msra.gmra.mrb[28].mxu0 %vm136_vm2, %v2298_v2 }
 0xd24   :  { %1836 = vmatprep.mubr.msk.bf16.mxu0 %vm2140_vm0, %v2139_v0 }
 0xd92   :  { %v1140_v19 = vpop.permute.xlu1 %1139 }
 0xd93   :  { %1142 = vst.msk [vmem:[#allocation2] sm:$0xff] %vm186_vm3, %v1140_v19 }
 0xd9a   :  { %v1233_v47 = vld [vmem:[#allocation2] sm:$0xff] }
 0xdf6   :  { %v1177_v20 = vpop.f32.mrb[28].mxu0 }
 0xdf7   :  { %v1832_v21 = vpop.f32.mrb[29].mxu0 }
 0xdf8   :  { %v1180_v22 = vpop.f32.mrb[30].mxu0 }
 0xdf9   :  { %v1184_v23 = vpack.c.bf16 %v1180_v22, %v1177_v20  ;;  %v1833_v24 = vpop.f32.mrb[31].mxu0 }
 0xdfb   :  { %1185 = vst.msk [vmem:[#allocation2 + $0x8] sm:$0xff] %vm129_vm1, %v1184_v23  ;;  %1835 = vmatpush3.bf16.msra.mxu0 %v1184_v23 }
 0xdfc   :  { %1739 = vmatprep.subr.bf16.mxu0 %v1922_v25 }
 0xdfe   :  { %1837 = vmatmul.mubr.msk.bf16.vlgmr.msra.gmra.mrb[32].mxu0 %vm136_vm2, %v2298_v2  ;;  %v1932_v2 = vld [vmem:[#allocation8 + $0x1e8] sm:$0xff]  }
 0xdff   :  { %1740 = vmatpush3.bf16.msra.mxu0 %v1923_v26 }
 0xe00   :  { %1741 = vmatprep.subr.bf16.mxu0 %v1924_v27 }
 0xe03   :  { %1742 = vmatpush3.bf16.msra.mxu0 %v1925_v28 }
 0xe04   :  { %1743 = vmatprep.subr.bf16.mxu0 %v1926_v29 }
 0xe07   :  { %1744 = vmatpush3.bf16.msra.mxu0 %v1927_v30 }
 0xe08   :  { %1745 = vmatprep.subr.bf16.mxu0 %v1928_v31 }
 0xe0b   :  { %1746 = vmatpush3.bf16.msra.mxu0 %v1929_v32 }
 0xe0c   :  { %1747 = vmatprep.subr.bf16.mxu0 %v1930_v33 }
 0xe0f   :  { %1748 = vmatpush3.bf16.msra.mxu0 %v1931_v34 }
 0xe10   :  { %1749 = vmatprep.subr.bf16.mxu0 %v1932_v2 }
 0xe13   :  { %1750 = vmatpush3.bf16.msra.mxu0 %v1933_v35 }
 0xe14   :  { %1751 = vmatprep.subr.bf16.mxu0 %v1934_v36 }
 0xe17   :  { %1752 = vmatpush3.bf16.msra.mxu0 %v1935_v37 }
 0xe18   :  { %1753 = vmatprep.subr.bf16.mxu0 %v1936_v38 }
 0xe1b   :  { %1754 = vmatpush3.bf16.msra.mxu0 %v1937_v39 }
 0xed1   :  { %v1220_v40 = vpop.f32.mrb[32].mxu0 }
 0xed2   :  { %v1838_v41 = vpop.f32.mrb[33].mxu0 }
 0xed3   :  { %v1223_v42 = vpop.f32.mrb[34].mxu0 }
 0xed4   :  { %v1227_v43 = vpack.c.bf16 %v1223_v42, %v1220_v40  ;;  %v1839_v44 = vpop.f32.mrb[35].mxu0 }
 0xed6   :  { %1229 = vrot.lane.b32.xlu0 %v1227_v43, %s2130_s13  ;;  %s1548_s13 = sshll.u32 %s2141_s6, 4  ;;  %s1549_s13 = int_to_ptr.vmem [resolvable:$true] %s1548_s13 }
 0xed7   :  { %s2096_s18 = scalar_lea.vmem %s1549_s13, 128  ;;  %p2101_p1 = scmp.lt.s32.totalorder %s1549_s13, %s1549_s13 }
 0xed8   :  { %p2097_p0 = scmp.ne.s32.totalorder %s1549_s13, %s2096_s18  ;;  %p2102_p2 = scmp.lt.s32.totalorder %s2096_s18, %s2096_s18 }
 0xeda   :  { %p2103_p3 = por %p2102_p2, %p2101_p1 }
 0xedc   :  { %p2104_p4 = pnand %p2103_p3, %p2097_p0 }
 0xf48   :  { %v1230_v45 = vpop.permute.xlu0 %1229 }
 0xf49   :  { %1232 = vst.msk [vmem:[#allocation2 + $0x8] sm:$0xff] %vm186_vm3, %v1230_v45 }
 0xf50   :  { %v1234_v46 = vld [vmem:[#allocation2 + $0x8] sm:$0xff] }
 0xf51   :  { %1404 = vmatprep.mubr.bf16.mxu0 %v1234_v46 }
 0xf52   :  { %1405 = vmatmul.mubr.bf16.vlgmr.msra.gmra.mrb[36].mxu0 %v1233_v47 }
0x1025   :  { %v1755_v48 = vpop.f32.mrb[36].mxu0 }
0x1026   :  { %v1756_v49 = vpop.f32.mrb[37].mxu0 }
0x1027   :  { %v1757_v50 = vadd.f32 %v1756_v49, %v1755_v48  ;;  %v1758_v51 = vpop.f32.mrb[38].mxu0 }
0x1028   :  { %v1759_v53 = vpop.f32.mrb[39].mxu0 }
0x1029   :  { %v1760_v54 = vadd.f32 %v1759_v53, %v1758_v51  ;;  %v1407_v55 = vadd.f32 %v1757_v50, %v1625_v52 }
0x102b   :  { %v1410_v56 = vadd.f32 %v1760_v54, %v1625_v52 }
0x102d   :  { %v1413_v57 = vpack.c.bf16 %v1410_v56, %v1407_v55 }
0x102f   :  { %1841 = vmatpush3.bf16.msra.mxu1 %v1413_v57 }
0x1030   :  { %1846 = vmatprep.subr.bf16.mxu1 %v2139_v0 }
0x1032   :  { %1843 = vmatmul.mubr.msk.bf16.vlgmr.msra.gmra.mrb[24].mxu1 %vm136_vm2, %v1414_v58 }
0x1033   :  { %1847 = vmatpush3.bf16.msra.mxu1 %v1938_v59  ;;  %1854 = vmatprep.mubr.msk.bf16.mxu1 %vm2140_vm0, %v2139_v0 }
0x1034   :  { %1848 = vmatprep.subr.bf16.mxu1 %v2139_v0 }
0x1037   :  { %1849 = vmatpush3.bf16.msra.mxu1 %v1939_v60 }
0x1038   :  { %1850 = vmatprep.subr.bf16.mxu1 %v2139_v0 }
0x103b   :  { %1851 = vmatpush3.bf16.msra.mxu1 %v1940_v61 }
0x103c   :  { %1852 = vmatprep.subr.bf16.mxu1 %v2139_v0 }
0x103f   :  { %1853 = vmatpush3.bf16.msra.mxu1 %v1941_v62 }
0x1105   :  { %v1452_v63 = vpop.f32.mrb[24].mxu1 }
0x1106   :  { %v1458_v1 = vpack.c.bf16 %v1452_v63, %v1452_v63  ;;  %v1844_v3 = vpop.f32.mrb[25].mxu1 }
0x1107   :  { %v1455_v4 = vpop.f32.mrb[26].mxu1 }
0x1108   :  { %v1845_v5 = vpop.f32.mrb[27].mxu1  ;;  %1855 = vmatmul.mubr.msk.bf16.vlgmr.msra.gmra.mrb[28].mxu1 %vm129_vm1, %v1458_v1 }
0x11db   :  { %v1535_v7 = vpop.f32.mrb[28].mxu1 }
0x11dc   :  { %v1536_v8 = vadd.f32 %v1643_v6, %v1535_v7  ;;  %v1856_v9 = vpop.f32.mrb[29].mxu1 }
0x11dd   :  { %v1538_v10 = vpop.f32.mrb[30].mxu1 }
0x11de   :  { %1541 = vst [vmem:[#allocation15] sm:$0xff] %v1536_v8  ;;  %v1857_v11 = vpop.f32.mrb[31].mxu1 }
0x11df   :  { %2107 = shalt.err (!%p2104_p4)
}
0x11e0   :  { %s2108_s9 = scalar_lea.hbm %s2408_s7, 128 }
0x11e1   :  { %p2109_p5 = scmp.ne.s32.totalorder %s2408_s7, %s2108_s9  ;;  %p2112_p6 = scmp.lt.u32.totalorder %s2108_s9, %s2408_s7 }
0x11e3   :  { %p2114_p7 = pnand %p2112_p6, %p2109_p5 }
0x11e5   :  { %2117 = shalt.err (!%p2114_p7)
}
0x11e6   :  { %1551 = dma.vmem_to_hbm [thread:$0]  %s1549_s13, 128, %s2408_s7, [#allocation5]  }
0x11e7   :  { %2126 = dma.done.wait [#allocation5], 128  }
0x11e8   :  { %2127 = vsyncadd [#allocation5], 4294967168 }
0x11e9   :  { %1555 = vsyncpa [#allocation4], 1 }
0x11ea   :  { %1556 = vsyncpa [#allocation7], 1 }
0x11eb   :  { %1557 = vsyncpa [#allocation10], 1 }
0x11ec   :  { %1558 = vsyncpa [#allocation13], 1 }
0x11ed   :  { %1559 = vsyncpa [#allocation5], 1 }

</bundles_post_ra>
